<compile_context>
chip_gen: v5e
topology: v5e:2x2
jax: 0.10.0
libtpu: 0.0.40
codegen_flags: <defaults>
</compile_context>

<pallas_src>
import jax
import jax.numpy as jnp
from jax.experimental import pallas as pl
from jax.experimental.pallas import tpu as pltpu


def _round_up(x, m):
    return ((x + m - 1) // m) * m


def _pad_to(a, rows, cols, dtype):
    """Cast to `dtype` and zero-pad a 2-D array up to (rows, cols)."""
    a = a.astype(dtype)
    pr, pc = rows - a.shape[0], cols - a.shape[1]
    if pr or pc:
        a = jnp.pad(a, ((0, pr), (0, pc)))
    return a


def _linear_kernel(x_ref, w_ref, b_ref, o_ref, acc_ref):
    # x_ref: [tm, tk] bf16, w_ref: [tk, tn] bf16, b_ref: [1, tn] f32
    # o_ref: [tm, tn] out-dtype, acc_ref: [tm, tn] f32 (resident across K)
    k = pl.program_id(2)

    @pl.when(k == 0)
    def _init():
        # Fold the bias in exactly once by initializing the accumulator with it.
        acc_ref[...] = jnp.broadcast_to(b_ref[...], acc_ref.shape)

    acc_ref[...] += jnp.dot(
        x_ref[...], w_ref[...], preferred_element_type=jnp.float32
    )

    @pl.when(k == pl.num_programs(2) - 1)
    def _finalize():
        o_ref[...] = acc_ref[...].astype(o_ref.dtype)


def linear_forward(x, weight_t, bias):
    """Flatten(x) @ weight_t + bias   (nn.Flatten -> nn.Linear forward).

    x:        [B, ...]        trailing dims flattened, like nn.Flatten()
    weight_t: [D_in, D_out]   nn.Linear weight, pre-transposed once offline
    bias:     [D_out]
    """
    B = x.shape[0]
    d_in, d_out = weight_t.shape
    x2d = x.reshape(B, -1)
    assert x2d.shape[1] == d_in, (x2d.shape, d_in)
    out_dtype = x2d.dtype

    # --- tile sizes: sublane-aligned M, lane-dense N, MXU-aligned K ---------
    tm = min(_round_up(B, 8), 128)          # >= 8 f32 sublanes
    tn = min(_round_up(d_out, 128), 256)    # multiple of 128 lanes
    tk = min(_round_up(d_in, 256), 512)     # multiple of 256 (and of 128)

    Mp = _round_up(B, tm)
    Np = _round_up(d_out, tn)
    Kp = _round_up(d_in, tk)

    # --- pad + cast: bf16 MXU operands, f32 bias/accumulator ----------------
    x_p = _pad_to(x2d, Mp, Kp, jnp.bfloat16)
    w_p = _pad_to(weight_t, Kp, Np, jnp.bfloat16)
    b_p = _pad_to(bias.reshape(1, d_out), 1, Np, jnp.float32)

    grid = (Mp // tm, Np // tn, Kp // tk)

    cost = pl.CostEstimate(
        flops=2 * Mp * Kp * Np,
        transcendentals=0,
        bytes_accessed=(x_p.size * 2 + w_p.size * 2 + b_p.size * 4
                        + Mp * Np * x2d.dtype.itemsize),
    )

    out_p = pl.pallas_call(
        _linear_kernel,
        out_shape=jax.ShapeDtypeStruct((Mp, Np), out_dtype),
        grid_spec=pltpu.PrefetchScalarGridSpec(
            num_scalar_prefetch=0,
            grid=grid,
            in_specs=[
                pl.BlockSpec((tm, tk), lambda i, j, k: (i, k)),   # x tile
                pl.BlockSpec((tk, tn), lambda i, j, k: (k, j)),   # W tile
                pl.BlockSpec((1, tn), lambda i, j, k: (0, j)),    # bias tile
            ],
            out_specs=pl.BlockSpec((tm, tn), lambda i, j, k: (i, j)),
            scratch_shapes=[pltpu.VMEM((tm, tn), jnp.float32)],
        ),
        compiler_params=pltpu.CompilerParams(
            dimension_semantics=("parallel", "parallel", "arbitrary"),
        ),
        cost_estimate=cost,
    )(x_p, w_p, b_p)

    # Strip M/N padding (small crop, already in caller dtype).
    return out_p[:B, :d_out]


if __name__ == "__main__":
    # Small shapes consistent with the module: batch=2, channels=4, spatial=16
    B, C, H, W = 2, 4, 16, 16
    in_dim = C * H * W          # 1024
    out_dim = 32

    key = jax.random.PRNGKey(0)
    kx, kw, kb = jax.random.split(key, 3)

    x = jax.random.normal(kx, (B, C, H, W), dtype=jnp.float32)

    # Parameter init mirroring nn.Linear's uniform(-1/sqrt(in), 1/sqrt(in)),
    # torch layout [out, in]; transpose ONCE outside the hot path.
    bound = 1.0 / (in_dim ** 0.5)
    weight = jax.random.uniform(kw, (out_dim, in_dim), minval=-bound,
                                maxval=bound, dtype=jnp.float32)
    bias = jax.random.uniform(kb, (out_dim,), minval=-bound, maxval=bound,
                              dtype=jnp.float32)
    weight_t = jnp.asarray(weight.T)   # [in_dim, out_dim]

    out = linear_forward(x, weight_t, bias)
    jax.block_until_ready(out)
    assert out.shape == (B, out_dim), out.shape
    assert out.dtype == x.dtype, out.dtype

    # Reference 1: same precision regime as the kernel (bf16 inputs, f32 acc).
    x2d = x.reshape(B, -1)
    ref_bf16 = (jnp.dot(x2d.astype(jnp.bfloat16),
                        weight_t.astype(jnp.bfloat16),
                        preferred_element_type=jnp.float32)
                + bias).astype(x.dtype)
    assert jnp.allclose(out, ref_bf16, atol=1e-3, rtol=1e-3)

    # Reference 2: full-f32 module semantics (loose tolerance for bf16 stream).
    ref_f32 = x2d @ weight_t + bias
    assert jnp.allclose(out, ref_f32, atol=3e-2, rtol=3e-2)

    print("KERNEL_OK")
</pallas_src>

<mosaic_0001>
module attributes {stable_mosaic.version = 11 : i64} {
  func.func @_linear_kernel(%arg0: i32, %arg1: i32, %arg2: i32, %arg3: memref<8x512xbf16, #tpu.memory_space<vmem>>, %arg4: memref<512x128xbf16, #tpu.memory_space<vmem>>, %arg5: memref<1x128xf32, #tpu.memory_space<vmem>>, %arg6: memref<8x128xf32, #tpu.memory_space<vmem>>, %arg7: memref<8x128xf32, #tpu.memory_space<vmem>>) attributes {dimension_semantics = [#tpu.dimension_semantics<parallel>, #tpu.dimension_semantics<parallel>, #tpu.dimension_semantics<arbitrary>], iteration_bounds = array<i64: 1, 1, 2>, scalar_prefetch = 0 : i64, scratch_operands = 1 : i64, tpu.core_type = #tpu.core_type<tc>, window_params = [{transform_indices = @transform_0, window_bounds = array<i64: 8, 512>}, {transform_indices = @transform_1, window_bounds = array<i64: 512, 128>}, {transform_indices = @transform_2, window_bounds = array<i64: 1, 128>}, {transform_indices = @transform_3, window_bounds = array<i64: 8, 128>}]} {
    %c0_i32 = arith.constant 0 : i32
    %0 = arith.cmpi eq, %arg2, %c0_i32 : i32
    %1 = arith.extui %0 : i1 to i32
    %c0_i32_0 = arith.constant 0 : i32
    %2 = arith.cmpi ne, %1, %c0_i32_0 : i32
    scf.if %2 {
      %c0_9 = arith.constant 0 : index
      %c0_10 = arith.constant 0 : index
      %12 = vector.load %arg5[%c0_9, %c0_10] : memref<1x128xf32, #tpu.memory_space<vmem>>, vector<1x128xf32>
      %13 = vector.shape_cast %12 : vector<1x128xf32> to vector<1x128xf32>
      %14 = vector.broadcast %13 : vector<1x128xf32> to vector<8x128xf32>
      %c0_11 = arith.constant 0 : index
      %c0_12 = arith.constant 0 : index
      %15 = vector.load %arg7[%c0_11, %c0_12] : memref<8x128xf32, #tpu.memory_space<vmem>>, vector<8x128xf32>
      tpu.vector_store %arg7[%c0_11, %c0_12], %14 {strides = array<i32>} : memref<8x128xf32, #tpu.memory_space<vmem>>, vector<8x128xf32>,
    } else {
    }
    %c0 = arith.constant 0 : index
    %c0_1 = arith.constant 0 : index
    %3 = vector.load %arg7[%c0, %c0_1] : memref<8x128xf32, #tpu.memory_space<vmem>>, vector<8x128xf32>
    %c0_2 = arith.constant 0 : index
    %c0_3 = arith.constant 0 : index
    %4 = vector.load %arg3[%c0_2, %c0_3] : memref<8x512xbf16, #tpu.memory_space<vmem>>, vector<8x512xbf16>
    %c0_4 = arith.constant 0 : index
    %c0_5 = arith.constant 0 : index
    %5 = vector.load %arg4[%c0_4, %c0_5] : memref<512x128xbf16, #tpu.memory_space<vmem>>, vector<512x128xbf16>
    %cst = arith.constant dense<0.000000e+00> : vector<8x128xf32>
    %6 = tpu.matmul %4, %5, %cst {dimension_numbers = #tpu.dot_dimension_numbers<[1], [0], [0], [1], [0, 0, 1, 1], [], []>} : vector<8x512xbf16>, vector<512x128xbf16>, vector<8x128xf32> -> vector<8x128xf32>
    %7 = arith.addf %3, %6 : vector<8x128xf32>
    %c0_6 = arith.constant 0 : index
    %c0_7 = arith.constant 0 : index
    %8 = vector.load %arg7[%c0_6, %c0_7] : memref<8x128xf32, #tpu.memory_space<vmem>>, vector<8x128xf32>
    tpu.vector_store %arg7[%c0_6, %c0_7], %7 {strides = array<i32>} : memref<8x128xf32, #tpu.memory_space<vmem>>, vector<8x128xf32>,
    %c1_i32 = arith.constant 1 : i32
    %9 = arith.cmpi eq, %arg2, %c1_i32 : i32
    %10 = arith.extui %9 : i1 to i32
    %c0_i32_8 = arith.constant 0 : i32
    %11 = arith.cmpi ne, %10, %c0_i32_8 : i32
    scf.if %11 {
      %c0_9 = arith.constant 0 : index
      %c0_10 = arith.constant 0 : index
      %12 = vector.load %arg7[%c0_9, %c0_10] : memref<8x128xf32, #tpu.memory_space<vmem>>, vector<8x128xf32>
      %c0_11 = arith.constant 0 : index
      %c0_12 = arith.constant 0 : index
      %13 = vector.load %arg6[%c0_11, %c0_12] : memref<8x128xf32, #tpu.memory_space<vmem>>, vector<8x128xf32>
      tpu.vector_store %arg6[%c0_11, %c0_12], %12 {strides = array<i32>} : memref<8x128xf32, #tpu.memory_space<vmem>>, vector<8x128xf32>,
    } else {
    }
    return
  }
  func.func @transform_0(%arg0: i32, %arg1: i32, %arg2: i32) -> (i32, i32) {
    %c0_i32 = arith.constant 0 : i32
    return %arg0, %arg2 : i32, i32
  }
  func.func @transform_1(%arg0: i32, %arg1: i32, %arg2: i32) -> (i32, i32) {
    %c0_i32 = arith.constant 0 : i32
    return %arg2, %arg1 : i32, i32
  }
  func.func @transform_2(%arg0: i32, %arg1: i32, %arg2: i32) -> (i32, i32) {
    %c0_i32 = arith.constant 0 : i32
    %c0_i32_0 = arith.constant 0 : i32
    return %c0_i32, %arg1 : i32, i32
  }
  func.func @transform_3(%arg0: i32, %arg1: i32, %arg2: i32) -> (i32, i32) {
    %c0_i32 = arith.constant 0 : i32
    return %arg0, %arg1 : i32, i32
  }
}

</mosaic_0001>

<bundles_post_ra>
// kernel: tpu_custom_call.1
= control target key start
LH: loop header
LB: loop body
LE: loop exit
PB: predicated region body
PF: predicated region fallthrough
CT: control target
= control target key end

     0   :  { %8 = vsyncpa [#allocation4], 0  ;;  %s1304_s0 = inlined_call_operand.hbm [shape: bf16[8,1024], index: 0, kind: input, shape index: {}]   ;;  %s1305_s1 = inlined_call_operand.hbm [shape: bf16[1024,128], index: 1, kind: input, shape index: {}]   ;;  %s1306_s2 = inlined_call_operand.vmem [shape: f32[1,128], index: 2, kind: input, shape index: {}]   ;;  %s1307_s3 = inlined_call_operand.hbm [shape: f32[8,128], index: 3, kind: output, shape index: {}]  }
   0x1   :  { %10 = vsyncpa [#allocation4 + $0x1], 0 }
   0x2   :  { %11 = vsyncpa [#allocation7], 0 }
   0x3   :  { %13 = vsyncpa [#allocation7 + $0x1], 0 }
   0x4   :  { %14 = vsyncpa [#allocation5], 0  ;;  %s1149_s12 = smov 0   ;;  %s1151_s13 = smov 0  }
   0x5   :  { %s1153_s14 = smov 0   ;;  %s1155_s15 = smov 0  }
   0x6   :  { %s1157_s16 = smov 0   ;;  %s1159_s17 = smov 0  }
   0x7 LB: > { %s727_s18 = sadd.s32 4294967295, %s1124_s17   ;;  %s32_s19 = sadd.s32 1, %s1120_s16  ;;  %s1124_s17 = sphi %s1159_s17, %s20_s17   ;;  %s1120_s16 = sphi %s1157_s16, %s1315_s16   ;;  %s1116_s15 = sphi %s1155_s15, %s1314_s15   ;;  %s1112_s14 = sphi %s1153_s14, %s1313_s14   ;;  %s1108_s13 = sphi %s1151_s13, %s1312_s13   ;;  %s1104_s12 = sphi %s1149_s12, %s1311_s12  }
   0x8   : > { %p33_p0 = scmp.ge.s32.totalorder %s32_s19, 2  ;;  %s48_s20 = sadd.s32 1, %s1112_s14 }
   0x9   : > { %p55_p1 = scmp.ne.s32.totalorder %s1112_s14, %s1108_s13  ;;  %p56_p2 = scmp.eq.s32.totalorder %s1124_s17, 0 }
   0xa   : > { %s1317_s19 = smov (%p33_p0, %s32_s19), 0  ;;  %p61_p4 = scmp.ne.s32.totalorder %s1108_s13, %s1104_s12 }
   0xb   : > { %p1185_p3 = por %p56_p2, %p55_p1  ;;  %s44_s22 = ssub.s32 %s1120_s16, %s1317_s19 }
   0xc   : > { %p62_p5 = scmp.eq.s32.totalorder %s727_s18, 0  ;;  %p46_p6 = scmp.eq.s32.totalorder %s44_s22, 0 }
   0xd   : > { %p923_p8 = scmp.lt.s32.totalorder %s1124_s17, 2  ;;  %s1203_s25 = sand.u32 1, %s1112_s14  }
   0xe   : > { %p1194_p7 = por %p62_p5, %p61_p4  ;;  %s874_s26 = sshll.u32 %s1120_s16, 4 }
   0xf   : > { %s1200_s24 = scalar_select %p46_p6, %s1112_s14, %s48_s20  }
  0x10   : > { %s731_s27 = sshll.u32 %s1203_s25, 4  ;;  %s184_s30 = scalar_lea.hbm %s1304_s0, %s874_s26 }
  0x11   : > { %s186_s4 = sshll.u32 %s184_s30, 4  ;;  %s177_s5 = scalar_lea.vmem [#allocation3], %s731_s27  ;;  %s187_s4 = int_to_ptr.hbm [resolvable:$true] %s186_s4 }
  0x12   : > { %s188_s6 = sshll.u32 %s177_s5, 4  ;;  %p1212_p9 = pnand %p923_p8, %p1185_p3  ;;  %s189_s6 = int_to_ptr.vmem [resolvable:$true] %s188_s6 }
  0x13   : > { %p737_p10 = scmp.ge.s32.totalorder %s1124_s17, 1  ;;  %p216_p11 = scmp.lt.s32.totalorder %s1124_s17, 3 }
  0x14   : > { %s734_s8 = sshll.u32 %s1203_s25, 8  ;;  %s174_s9 = scalar_lea.sflag [#allocation4], %s1203_s25 }
  0x15   : > { %919 = dma.hbm_to_vmem [thread:$0]  (!%p1212_p9), %s187_s4, 256, %s189_s6, %s174_s9  }
  0x16   : > { %p217_p12 = pnand %p737_p10, %p216_p11  ;;  %s875_s10 = sshll.u32 %s1120_s16, 8 }
  0x17   : > { %s199_s11 = scalar_lea.vmem [#allocation6], %s734_s8  ;;  %s205_s21 = scalar_lea.hbm %s1305_s1, %s875_s10 }
  0x18   : > { %s208_s12 = sshll.u32 %s199_s11, 4  ;;  %s206_s26 = sshll.u32 %s205_s21, 4  ;;  %s209_s12 = int_to_ptr.vmem [resolvable:$true] %s208_s12  ;;  %s207_s26 = int_to_ptr.hbm [resolvable:$true] %s206_s26 }
  0x19   : > { %s196_s27 = scalar_lea.sflag [#allocation7], %s1203_s25  ;;  %s1126_s28 = smov 64  }
  0x1a   : > { %s1127_s29 = smov 4   ;;  %220 = sbr.rel (%p217_p12) target bundleno = 231 (0xe7), region = 32 }
  0x1b   : > { %922 = dma.hbm_to_vmem [thread:$0]  (!%p1212_p9), %s207_s26, 4096, %s209_s12, %s196_s27, %s1126_s28, %s1126_s28, %s1127_s29  }
  0x1c   : > { %s222_s30 = sand.u32 (!%p217_p12), 1, %s1108_s13  }
  0x1d   : > { %s738_s4 = sshll.u32 (!%p217_p12), %s222_s30, 4  ;;  %s223_s5 = scalar_lea.sflag (!%p217_p12), [#allocation4], %s222_s30 }
  0x1e   : > { %s1230_s6 = scalar_lea.vmem (!%p217_p12), [#allocation3], %s738_s4 }
  0x1f   : > { %1091 = dma.done.wait (%p1194_p7), %s223_s5, 256  }
  0x20   : > { %1093 = vsyncadd (%p1194_p7), %s223_s5, 4294967040  ;;  %s739_s8 = sshll.u32 %s222_s30, 8  ;;  %s233_s25 = scalar_lea.sflag [#allocation7], %s222_s30 }
  0x21   : > { %s1236_s9 = scalar_lea.vmem [#allocation6], %s739_s8 }
  0x22   : > { %1095 = dma.done.wait (%p1194_p7), %s233_s25, 4096  }
  0x23   : > { %1097 = vsyncadd (%p1194_p7), %s233_s25, 4294963200  ;;  %p740_p13 = scmp.ne.s32.totalorder %s1116_s15, 0 }
  0x25   : > { %271 = sbr.rel (%p740_p13) target bundleno = 44 (0x2c), region = 44 }
  0x2a   : > { %v977_v0 = vld [vmem:[%s1306_s2] ss:$0 sm:$0xff] }
  0x2b   : > { %276 = vst [vmem:[#allocation2] sm:$0xff] %v977_v0 }
  0x2c PF: > { %v883_v1 = vld [vmem:[%s1236_s9 + $0x38] sm:$0xff]  ;;  %v882_v5 = vld [vmem:[%s1236_s9 + $0x30] sm:$0xff]  ;;  %v881_v9 = vld [vmem:[%s1236_s9 + $0x28] sm:$0xff]  ;;  %p869_p0 = scmp.ne.s32.totalorder %s1116_s15, 1 }
  0x2d   : > { %v891_v2 = vld [vmem:[%s1236_s9 + $0x78] sm:$0xff]  ;;  %550 = vmatpush.bf16.msra.mxu0 %v883_v1  ;;  %v890_v6 = vld [vmem:[%s1236_s9 + $0x70] sm:$0xff]  ;;  %v889_v10 = vld [vmem:[%s1236_s9 + $0x68] sm:$0xff] }
  0x2e   : > { %v899_v3 = vld [vmem:[%s1236_s9 + $0xb8] sm:$0xff]  ;;  %563 = vmatpush.bf16.msra.mxu1 %v891_v2  ;;  %v898_v7 = vld [vmem:[%s1236_s9 + $0xb0] sm:$0xff]  ;;  %v897_v11 = vld [vmem:[%s1236_s9 + $0xa8] sm:$0xff] }
  0x2f   : > { %v907_v4 = vld [vmem:[%s1236_s9 + $0xf8] sm:$0xff]  ;;  %576 = vmatpush.bf16.msra.mxu2 %v899_v3  ;;  %v906_v8 = vld [vmem:[%s1236_s9 + $0xf0] sm:$0xff]  ;;  %v905_v12 = vld [vmem:[%s1236_s9 + $0xe8] sm:$0xff] }
  0x30   : > { %589 = vmatpush.bf16.msra.mxu3 %v907_v4  ;;  %v880_v13 = vld [vmem:[%s1236_s9 + $0x20] sm:$0xff]  ;;  %v879_v17 = vld [vmem:[%s1236_s9 + $0x18] sm:$0xff]  ;;  %v878_v21 = vld [vmem:[%s1236_s9 + $0x10] sm:$0xff] }
  0x31   : > { %551 = vmatpush.bf16.msra.mxu0 %v882_v5  ;;  %v888_v14 = vld [vmem:[%s1236_s9 + $0x60] sm:$0xff]  ;;  %v887_v18 = vld [vmem:[%s1236_s9 + $0x58] sm:$0xff]  ;;  %v886_v22 = vld [vmem:[%s1236_s9 + $0x50] sm:$0xff] }
  0x32   : > { %564 = vmatpush.bf16.msra.mxu1 %v890_v6  ;;  %v896_v15 = vld [vmem:[%s1236_s9 + $0xa0] sm:$0xff]  ;;  %v895_v19 = vld [vmem:[%s1236_s9 + $0x98] sm:$0xff]  ;;  %v894_v23 = vld [vmem:[%s1236_s9 + $0x90] sm:$0xff] }
  0x33   : > { %577 = vmatpush.bf16.msra.mxu2 %v898_v7  ;;  %v904_v16 = vld [vmem:[%s1236_s9 + $0xe0] sm:$0xff]  ;;  %v903_v20 = vld [vmem:[%s1236_s9 + $0xd8] sm:$0xff]  ;;  %v902_v24 = vld [vmem:[%s1236_s9 + $0xd0] sm:$0xff] }
  0x34   : > { %590 = vmatpush.bf16.msra.mxu3 %v906_v8  ;;  %v877_v25 = vld [vmem:[%s1236_s9 + $0x8] sm:$0xff]  ;;  %v278_v27 = vld [vmem:[%s1230_s6] sm:$0xff]  ;;  %v277_v51 = vld [vmem:[#allocation2] sm:$0xff] }
  0x35   : > { %552 = vmatpush.bf16.msra.mxu0 %v881_v9  ;;  %v885_v26 = vld [vmem:[%s1236_s9 + $0x48] sm:$0xff]  ;;  %v346_v31 = vunpack.c.l.b16 %v278_v27  ;;  %v347_v32 = vunpack.c.h.b16 %v278_v27  ;;  %v876_v33 = vld [vmem:[%s1236_s9] sm:$0xff] }
  0x36   : > { %565 = vmatpush.bf16.msra.mxu1 %v889_v10  ;;  %v893_v28 = vld [vmem:[%s1236_s9 + $0x88] sm:$0xff]  ;;  %v884_v34 = vld [vmem:[%s1236_s9 + $0x40] sm:$0xff] }
  0x37   : > { %578 = vmatpush.bf16.msra.mxu2 %v897_v11  ;;  %v901_v29 = vld [vmem:[%s1236_s9 + $0xc8] sm:$0xff]  ;;  %v892_v37 = vld [vmem:[%s1236_s9 + $0x80] sm:$0xff]  ;;  %v350_v39 = vpack.c.b16 %v346_v31, %v346_v31  ;;  %v351_v40 = vpack.c.b16 %v347_v32, %v347_v32 }
  0x38   : > { %591 = vmatpush.bf16.msra.mxu3 %v905_v12  ;;  %v279_v30 = vld [vmem:[%s1230_s6 + $0x8] sm:$0xff]  ;;  %v900_v38 = vld [vmem:[%s1236_s9 + $0xc0] sm:$0xff] }
  0x39   : > { %553 = vmatpush.bf16.msra.mxu0 %v880_v13  ;;  %v348_v35 = vunpack.c.l.b16 %v279_v30  ;;  %v349_v36 = vunpack.c.h.b16 %v279_v30 }
  0x3a   : > { %566 = vmatpush.bf16.msra.mxu1 %v888_v14 }
  0x3b   : > { %579 = vmatpush.bf16.msra.mxu2 %v896_v15  ;;  %v352_v41 = vpack.c.b16 %v348_v35, %v348_v35  ;;  %v353_v42 = vpack.c.b16 %v349_v36, %v349_v36 }
  0x3c   : > { %592 = vmatpush.bf16.msra.mxu3 %v904_v16 }
  0x3d   : > { %554 = vmatpush.bf16.msra.mxu0 %v879_v17 }
  0x3e   : > { %567 = vmatpush.bf16.msra.mxu1 %v887_v18 }
  0x3f   : > { %580 = vmatpush.bf16.msra.mxu2 %v895_v19 }
  0x40   : > { %593 = vmatpush.bf16.msra.mxu3 %v903_v20 }
  0x41   : > { %555 = vmatpush.bf16.msra.mxu0 %v878_v21 }
  0x42   : > { %568 = vmatpush.bf16.msra.mxu1 %v886_v22 }
  0x43   : > { %581 = vmatpush.bf16.msra.mxu2 %v894_v23 }
  0x44   : > { %594 = vmatpush.bf16.msra.mxu3 %v902_v24 }
  0x45   : > { %556 = vmatpush.bf16.msra.mxu0 %v877_v25 }
  0x46   : > { %569 = vmatpush.bf16.msra.mxu1 %v885_v26 }
  0x47   : > { %582 = vmatpush.bf16.msra.mxu2 %v893_v28 }
  0x48   : > { %595 = vmatpush.bf16.msra.mxu3 %v901_v29 }
  0x49   : > { %557 = vmatpush.bf16.msra.mxu0 %v876_v33 }
  0x4a   : > { %570 = vmatpush.bf16.msra.mxu1 %v884_v34 }
  0x4b   : > { %583 = vmatpush.bf16.msra.mxu2 %v892_v37 }
  0x4c   : > { %596 = vmatpush.bf16.msra.mxu3 %v900_v38  ;;  %558 = vmatmul.bf16.vlgmr.msra.gmra.mxu0 %v350_v39 }
  0x4d   : > { %571 = vmatmul.bf16.vlgmr.msra.gmra.mxu1 %v351_v40 }
  0x4e   : > { %584 = vmatmul.bf16.vlgmr.msra.gmra.mxu2 %v352_v41 }
  0x4f   : > { %597 = vmatmul.bf16.vlgmr.msra.gmra.mxu3 %v353_v42 }
  0xc9   : > { %v559_v43 = vpop.f32.mrf.mxu0 }
  0xca   : > { %v572_v44 = vpop.f32.mrf.mxu1 }
  0xcb   : > { %v573_v45 = vadd.f32 %v572_v44, %v559_v43 }
  0xd1   : > { %v585_v46 = vpop.f32.mrf.mxu2  ;;  %v561_v49 = vpop.f32.mrf.mxu0 }
  0xd2   : > { %v598_v47 = vpop.f32.mrf.mxu3  ;;  %v586_v48 = vadd.f32 %v585_v46, %v573_v45  ;;  %v574_v50 = vpop.f32.mrf.mxu1 }
  0xd4   : > { %v599_v52 = vadd.f32 %v598_v47, %v586_v48 }
  0xd6   : > { %v602_v53 = vadd.f32 %v599_v52, %v277_v51  ;;  %607 = sbr.rel (%p869_p0) target bundleno = 225 (0xe1), region = 48 }
  0xd8   : > { %603 = vst [vmem:[#allocation2] sm:$0xff] %v602_v53 }
  0xd9   : > { %v587_v54 = vpop.f32.mrf.mxu2 }
  0xda   : > { %v600_v55 = vpop.f32.mrf.mxu3 }
  0xdf   : > { %v608_v56 = vld [vmem:[#allocation2] sm:$0xff] }
  0xe0   : > { %609 = vst [vmem:[#allocation8] sm:$0xff] %v608_v56 }
  0xe1 PF: > { %p924_p1 = scmp.eq.s32.totalorder %s727_s18, 1  ;;  %s621_s12 = sshll.u32 %s1307_s3, 4  ;;  %s622_s12 = int_to_ptr.hbm [resolvable:$true] %s621_s12 }
  0xe2   : > { %s1128_s20 = smov [#allocation8]  }
  0xe3   : > { %s619_s22 = sshll.u32 %s1128_s20, 4  ;;  %s620_s22 = int_to_ptr.vmem [resolvable:$true] %s619_s22 }
  0xe4   : > { %913 = dma.vmem_to_hbm [thread:$0]  (%p924_p1), %s620_s22, 128, %s622_s12, [#allocation5]  }
  0xe5   : > { %1099 = dma.done.wait (%p924_p1), [#allocation5], 128  }
  0xe6   : > { %1101 = vsyncadd (%p924_p1), [#allocation5], 4294967168 }
  0xe7 PF: > { %s20_s17 = sadd.s32 1, %s1124_s17   ;;  %s1311_s12 = smov %s1108_s13 }
  0xe8   : > { %p17_p2 = scmp.ge.s32.totalorder %s20_s17, 4   ;;  %s1312_s13 = smov %s1112_s14 }
  0xe9   : > { %s1313_s14 = smov %s1200_s24  ;;  %s1314_s15 = smov %s1120_s16 }
  0xea   : > { %s1315_s16 = smov %s1317_s19  ;;  %19 = sbr.rel (!%p17_p2) target bundleno = 7 (0x7), region = 94 }
  0xef   :  { %635 = vsyncpa [#allocation4], 1 }
  0xf0   :  { %637 = vsyncpa [#allocation4 + $0x1], 1 }
  0xf1   :  { %638 = vsyncpa [#allocation7], 1 }
  0xf2   :  { %640 = vsyncpa [#allocation7 + $0x1], 1 }
  0xf3   :  { %641 = vsyncpa [#allocation5], 1 }
  0xf4   :  { %643 = vsyncpa [#allocation5 + $0x1], 1 }

</bundles_post_ra>
